<compile_context>
chip_gen: v5e
topology: v5e:2x2
jax: 0.10.0
libtpu: 0.0.40
codegen_flags: <defaults>
</compile_context>

<pallas_src>
import functools
import math

import jax
import jax.numpy as jnp
from jax import lax
from jax.experimental import pallas as pl
from jax.experimental.pallas import tpu as pltpu

_MAX_TILE_ROWS = 2048      # 2048 x 128 f32 = 1 MiB per output block
_SMALL_ROWS = 64           # below this, one block (host overhead dominates)
_TWO_PI = 2.0 * math.pi
_GOLDEN = 0x9E3779B9


def _round_up16(x):
    return ((int(x) + 15) // 16) * 16


def _mix32(x):
    """lowbias32 avalanche hash (uint32 -> uint32). Fallback path only."""
    x = x ^ (x >> 16)
    x = x * jnp.uint32(0x7FEB352D)
    x = x ^ (x >> 15)
    x = x * jnp.uint32(0x846CA68B)
    x = x ^ (x >> 16)
    return x


def _bits_to_unit_float(bits):
    """uint32 bits -> float32 in [1.0, 2.0) via mantissa bit trick (VALU only)."""
    return lax.bitcast_convert_type(
        (bits >> 9) | jnp.uint32(0x3F800000), jnp.float32)


def _noise_kernel(seed_ref, o_ref, *, use_hw_prng):
    tile_r = o_ref.shape[0]
    half = tile_r // 2          # one uniform pair drives TWO output elements
    blk = pl.program_id(0)

    if use_hw_prng:
        # Seed once per (call, block): output is deterministic regardless of
        # how the grid blocks are split across TensorCores (v7x megacore).
        pltpu.prng_seed(seed_ref[0], blk)
        bits = pltpu.prng_random_bits((tile_r, 128))
        if bits.dtype != jnp.uint32:
            bits = pltpu.bitcast(bits, jnp.uint32)
        bits1 = bits[0:half, :]
        bits2 = bits[half:, :]
    else:
        # Portable counter-hash fallback (non-TPU / interpret backends).
        s = seed_ref[0].astype(jnp.uint32)
        key = _mix32(s * jnp.uint32(_GOLDEN) + jnp.uint32(0x3C6EF372))
        blk_u = lax.convert_element_type(blk, jnp.uint32)
        row = lax.broadcasted_iota(jnp.uint32, (half, 128), 0)
        col = lax.broadcasted_iota(jnp.uint32, (half, 128), 1)
        ctr = (blk_u * jnp.uint32(half) + row) * jnp.uint32(128) + col
        bits1 = _mix32(ctr + key)
        bits2 = _mix32(bits1 ^ jnp.uint32(_GOLDEN))   # chained: one mix cheaper

    # Uniforms: u1 in (0, 1]  (log-safe), u2 in [0, 1).
    u1 = jnp.float32(2.0) - _bits_to_unit_float(bits1)
    u2 = _bits_to_unit_float(bits2) - jnp.float32(1.0)

    # Box-Muller with a single trig call:
    #   z1 = r*cos(theta),  z2 = r*sin(theta) = r*sign*sqrt(1 - cos^2),
    #   sin(theta) >= 0  iff  theta in [0, pi)  iff  u2 < 0.5.
    r = jnp.sqrt(jnp.float32(-2.0) * jnp.log(u1))
    c = jnp.cos(jnp.float32(_TWO_PI) * u2)
    s_abs = jnp.sqrt(jnp.maximum(jnp.float32(1.0) - c * c, jnp.float32(0.0)))
    s = jnp.where(u2 < jnp.float32(0.5), s_abs, -s_abs)
    o_ref[0:half, :] = r * c
    o_ref[half:, :] = r * s


@functools.partial(jax.jit, static_argnums=(1, 2, 3))
def _generate_noise_slab(seed_arr, rows, tile_r, use_hw_prng):
    """Generate a (rows, 128) slab of iid N(0,1) float32 samples."""
    num_blocks = int(pl.cdiv(rows, tile_r))
    n_elems = rows * 128
    return pl.pallas_call(
        functools.partial(_noise_kernel, use_hw_prng=use_hw_prng),
        out_shape=jax.ShapeDtypeStruct((rows, 128), jnp.float32),
        grid=(num_blocks,),
        in_specs=[pl.BlockSpec(memory_space=pltpu.MemorySpace.SMEM)],
        out_specs=pl.BlockSpec((tile_r, 128), lambda i: (i, 0)),
        compiler_params=pltpu.CompilerParams(
            dimension_semantics=("parallel",),
            vmem_limit_bytes=32 * 1024 * 1024),
        cost_estimate=pl.CostEstimate(
            flops=20 * n_elems,
            transcendentals=2 * n_elems,
            bytes_accessed=4 * n_elems),
    )(seed_arr)


class NoiseGenerator:
    """JAX/Pallas equivalent of the PyTorch NoiseGenerator module."""

    def __init__(self, seed=0):
        self._seed = int(seed) & 0x7FFFFFFF
        self._counter = 0  # advances per call, like torch's RNG state
        self._use_hw_prng = jax.default_backend() == "tpu"

    def to(self, device):  # API parity with the torch module
        return self

    def __call__(self, size):
        return self.forward(size)

    def forward(self, size):
        if isinstance(size, int):
            size = (size,)
        size = tuple(int(s) for s in size)
        total = 1
        for s in size:
            total *= s

        rows_needed = max(int(pl.cdiv(max(total, 1), 128)), 1)
        if rows_needed <= _SMALL_ROWS:
            # Small: one aligned block; pad the slab to a full block.
            tile_r = _round_up16(rows_needed)
            rows = tile_r
        elif rows_needed <= 2 * _MAX_TILE_ROWS:
            # Medium: exactly 2 blocks so a v7x megacore can use both cores.
            # Slab rows == rows needed: Pallas masks the ragged last block's
            # writeback, so no truncation copy when total % 128 == 0.
            tile_r = _round_up16(pl.cdiv(rows_needed, 2))
            rows = rows_needed
        else:
            tile_r = _MAX_TILE_ROWS
            rows = rows_needed

        call_seed = (self._seed + 0x632BE5AB * self._counter) & 0x7FFFFFFF
        self._counter += 1
        seed_arr = jnp.asarray([call_seed], dtype=jnp.int32)

        slab = _generate_noise_slab(seed_arr, int(rows), int(tile_r),
                                    self._use_hw_prng)
        padded_total = rows * 128
        flat = slab.reshape(padded_total)
        if padded_total != total:   # only pay the slicing copy when padding exists
            flat = flat[:total]
        return flat.reshape(size)


if __name__ == "__main__":
    # Deterministic setup: seed derived from PRNGKey(0).
    key = jax.random.PRNGKey(0)
    seed = int(jax.random.randint(key, (), 0, 2**31 - 1))

    gen = NoiseGenerator(seed=seed).to("tpu")

    size = (2, 4, 16, 16)
    out = gen(size)
    out = jax.block_until_ready(out)

    assert out.shape == size, f"bad shape {out.shape}"
    assert out.dtype == jnp.float32, f"bad dtype {out.dtype}"
    m = float(jnp.mean(out))
    s = float(jnp.std(out))
    assert abs(m) < 0.2 and 0.8 < s < 1.2, f"bad stats mean={m} std={s}"

    # A second call must advance the generator state (fresh noise).
    out2 = jax.block_until_ready(gen(size))
    assert out2.shape == size
    assert not bool(jnp.allclose(out, out2)), "RNG state did not advance"

    print("KERNEL_OK")
</pallas_src>

<mosaic_0001>
module attributes {stable_mosaic.version = 11 : i64} {
  func.func @_noise_kernel(%arg0: i32, %arg1: memref<1xi32, #tpu.memory_space<smem>>, %arg2: memref<16x128xf32, #tpu.memory_space<vmem>>) attributes {dimension_semantics = [#tpu.dimension_semantics<parallel>], iteration_bounds = array<i64: 1>, scalar_prefetch = 0 : i64, scratch_operands = 0 : i64, tpu.core_type = #tpu.core_type<tc>, window_params = [{transform_indices = @transform_0, window_bounds = array<i64: 1>}, {transform_indices = @transform_1, window_bounds = array<i64: 16, 128>}]} {
    %c0 = arith.constant 0 : index
    %0 = memref.load %arg1[%c0] : memref<1xi32, #tpu.memory_space<smem>>
    %c-1640531527_i32 = arith.constant -1640531527 : i32
    %1 = arith.muli %0, %c-1640531527_i32 : i32
    %c1013904242_i32 = arith.constant 1013904242 : i32
    %2 = arith.addi %1, %c1013904242_i32 : i32
    %c16_i32 = arith.constant 16 : i32
    %3 = arith.shrui %2, %c16_i32 : i32
    %4 = arith.xori %2, %3 : i32
    %c2146121005_i32 = arith.constant 2146121005 : i32
    %5 = arith.muli %4, %c2146121005_i32 : i32
    %c15_i32 = arith.constant 15 : i32
    %6 = arith.shrui %5, %c15_i32 : i32
    %7 = arith.xori %5, %6 : i32
    %c-2073254261_i32 = arith.constant -2073254261 : i32
    %8 = arith.muli %7, %c-2073254261_i32 : i32
    %c16_i32_0 = arith.constant 16 : i32
    %9 = arith.shrui %8, %c16_i32_0 : i32
    %10 = arith.xori %8, %9 : i32
    %11 = tpu.iota {dimensions = array<i32: 0>} : vector<8x128xi32>
    %12 = tpu.iota {dimensions = array<i32: 1>} : vector<8x128xi32>
    %c8_i32 = arith.constant 8 : i32
    %13 = arith.muli %arg0, %c8_i32 : i32
    %14 = vector.broadcast %13 : i32 to vector<8x128xi32>
    %15 = arith.addi %14, %11 : vector<8x128xi32>
    %c128_i32 = arith.constant 128 : i32
    %16 = vector.broadcast %c128_i32 : i32 to vector<8x128xi32>
    %17 = arith.muli %15, %16 : vector<8x128xi32>
    %18 = arith.addi %17, %12 : vector<8x128xi32>
    %19 = vector.broadcast %10 : i32 to vector<8x128xi32>
    %20 = arith.addi %18, %19 : vector<8x128xi32>
    %c16_i32_1 = arith.constant 16 : i32
    %21 = vector.broadcast %c16_i32_1 : i32 to vector<8x128xi32>
    %22 = arith.shrui %20, %21 : vector<8x128xi32>
    %23 = arith.xori %20, %22 : vector<8x128xi32>
    %c2146121005_i32_2 = arith.constant 2146121005 : i32
    %24 = vector.broadcast %c2146121005_i32_2 : i32 to vector<8x128xi32>
    %25 = arith.muli %23, %24 : vector<8x128xi32>
    %c15_i32_3 = arith.constant 15 : i32
    %26 = vector.broadcast %c15_i32_3 : i32 to vector<8x128xi32>
    %27 = arith.shrui %25, %26 : vector<8x128xi32>
    %28 = arith.xori %25, %27 : vector<8x128xi32>
    %c-2073254261_i32_4 = arith.constant -2073254261 : i32
    %29 = vector.broadcast %c-2073254261_i32_4 : i32 to vector<8x128xi32>
    %30 = arith.muli %28, %29 : vector<8x128xi32>
    %c16_i32_5 = arith.constant 16 : i32
    %31 = vector.broadcast %c16_i32_5 : i32 to vector<8x128xi32>
    %32 = arith.shrui %30, %31 : vector<8x128xi32>
    %33 = arith.xori %30, %32 : vector<8x128xi32>
    %c-1640531527_i32_6 = arith.constant -1640531527 : i32
    %34 = vector.broadcast %c-1640531527_i32_6 : i32 to vector<8x128xi32>
    %35 = arith.xori %33, %34 : vector<8x128xi32>
    %c16_i32_7 = arith.constant 16 : i32
    %36 = vector.broadcast %c16_i32_7 : i32 to vector<8x128xi32>
    %37 = arith.shrui %35, %36 : vector<8x128xi32>
    %38 = arith.xori %35, %37 : vector<8x128xi32>
    %c2146121005_i32_8 = arith.constant 2146121005 : i32
    %39 = vector.broadcast %c2146121005_i32_8 : i32 to vector<8x128xi32>
    %40 = arith.muli %38, %39 : vector<8x128xi32>
    %c15_i32_9 = arith.constant 15 : i32
    %41 = vector.broadcast %c15_i32_9 : i32 to vector<8x128xi32>
    %42 = arith.shrui %40, %41 : vector<8x128xi32>
    %43 = arith.xori %40, %42 : vector<8x128xi32>
    %c-2073254261_i32_10 = arith.constant -2073254261 : i32
    %44 = vector.broadcast %c-2073254261_i32_10 : i32 to vector<8x128xi32>
    %45 = arith.muli %43, %44 : vector<8x128xi32>
    %c16_i32_11 = arith.constant 16 : i32
    %46 = vector.broadcast %c16_i32_11 : i32 to vector<8x128xi32>
    %47 = arith.shrui %45, %46 : vector<8x128xi32>
    %48 = arith.xori %45, %47 : vector<8x128xi32>
    %c9_i32 = arith.constant 9 : i32
    %49 = vector.broadcast %c9_i32 : i32 to vector<8x128xi32>
    %50 = arith.shrui %33, %49 : vector<8x128xi32>
    %c1065353216_i32 = arith.constant 1065353216 : i32
    %51 = vector.broadcast %c1065353216_i32 : i32 to vector<8x128xi32>
    %52 = arith.ori %50, %51 : vector<8x128xi32>
    %53 = tpu.bitcast %52 : vector<8x128xi32> -> vector<8x128xf32>
    %cst = arith.constant 2.000000e+00 : f32
    %54 = vector.broadcast %cst : f32 to vector<8x128xf32>
    %55 = arith.subf %54, %53 : vector<8x128xf32>
    %c9_i32_12 = arith.constant 9 : i32
    %56 = vector.broadcast %c9_i32_12 : i32 to vector<8x128xi32>
    %57 = arith.shrui %48, %56 : vector<8x128xi32>
    %c1065353216_i32_13 = arith.constant 1065353216 : i32
    %58 = vector.broadcast %c1065353216_i32_13 : i32 to vector<8x128xi32>
    %59 = arith.ori %57, %58 : vector<8x128xi32>
    %60 = tpu.bitcast %59 : vector<8x128xi32> -> vector<8x128xf32>
    %cst_14 = arith.constant 1.000000e+00 : f32
    %61 = vector.broadcast %cst_14 : f32 to vector<8x128xf32>
    %62 = arith.subf %60, %61 : vector<8x128xf32>
    %63 = math.log %55 : vector<8x128xf32>
    %cst_15 = arith.constant -2.000000e+00 : f32
    %64 = vector.broadcast %cst_15 : f32 to vector<8x128xf32>
    %65 = arith.mulf %64, %63 : vector<8x128xf32>
    %66 = math.sqrt %65 : vector<8x128xf32>
    %cst_16 = arith.constant 6.28318548 : f32
    %67 = vector.broadcast %cst_16 : f32 to vector<8x128xf32>
    %68 = arith.mulf %67, %62 : vector<8x128xf32>
    %69 = math.cos %68 : vector<8x128xf32>
    %70 = arith.mulf %69, %69 : vector<8x128xf32>
    %cst_17 = arith.constant 1.000000e+00 : f32
    %71 = vector.broadcast %cst_17 : f32 to vector<8x128xf32>
    %72 = arith.subf %71, %70 : vector<8x128xf32>
    %cst_18 = arith.constant 0.000000e+00 : f32
    %73 = vector.broadcast %cst_18 : f32 to vector<8x128xf32>
    %74 = arith.maximumf %72, %73 : vector<8x128xf32>
    %75 = math.sqrt %74 : vector<8x128xf32>
    %cst_19 = arith.constant 5.000000e-01 : f32
    %76 = vector.broadcast %cst_19 : f32 to vector<8x128xf32>
    %77 = arith.cmpf olt, %62, %76 : vector<8x128xf32>
    %cst_20 = arith.constant 0.000000e+00 : f32
    %78 = vector.broadcast %cst_20 : f32 to vector<8x128xf32>
    %79 = arith.subf %78, %75 : vector<8x128xf32>
    %80 = arith.select %77, %75, %79 : vector<8x128xi1>, vector<8x128xf32>
    %81 = arith.mulf %66, %69 : vector<8x128xf32>
    %c0_21 = arith.constant 0 : index
    %c0_22 = arith.constant 0 : index
    %82 = vector.load %arg2[%c0_21, %c0_22] : memref<16x128xf32, #tpu.memory_space<vmem>>, vector<8x128xf32>
    tpu.vector_store %arg2[%c0_21, %c0_22], %81 {strides = array<i32>} : memref<16x128xf32, #tpu.memory_space<vmem>>, vector<8x128xf32>,
    %83 = arith.mulf %66, %80 : vector<8x128xf32>
    %c8 = arith.constant 8 : index
    %c0_23 = arith.constant 0 : index
    %84 = vector.load %arg2[%c8, %c0_23] : memref<16x128xf32, #tpu.memory_space<vmem>>, vector<8x128xf32>
    tpu.vector_store %arg2[%c8, %c0_23], %83 {strides = array<i32>} : memref<16x128xf32, #tpu.memory_space<vmem>>, vector<8x128xf32>,
    return
  }
  func.func @transform_0(%arg0: i32) -> i32 {
    %c0_i32 = arith.constant 0 : i32
    %c0_i32_0 = arith.constant 0 : i32
    return %c0_i32 : i32
  }
  func.func @transform_1(%arg0: i32) -> (i32, i32) {
    %c0_i32 = arith.constant 0 : i32
    %c0_i32_0 = arith.constant 0 : i32
    return %arg0, %c0_i32 : i32, i32
  }
}

</mosaic_0001>

<bundles_post_ra>
// kernel: _generate_noise_slab.1
= control target key start
LH: loop header
LB: loop body
LE: loop exit
PB: predicated region body
PF: predicated region fallthrough
CT: control target
= control target key end

     0   :  { %7 = vsyncpa [#allocation4], 0  ;;  %v21_v0 = vlaneseq  ;;  %v313_v39 = vmov 683565275   ;;  %v314_v41 = vmov 2475754826   ;;  %s401_s0 = inlined_call_operand.<no memory space> [shape: s32[1], index: 0, kind: input, shape index: {}]   ;;  %s402_s1 = inlined_call_operand.hbm [shape: f32[16,128], index: 1, kind: output, shape index: {}]  }
   0x1   :  { %s11_s8 = smul.u32 2654435769, %s401_s0  ;;  %v315_v43 = vmov 2131351028   ;;  %v316_v45 = vmov 2102212464  }
   0x2   :  { %v22_v1 = vshrl.u32 %v21_v0, 7  ;;  %v24_v2 = vand.u32 127, %v21_v0  ;;  %v317_v47 = vmov 920167782   ;;  %v318_v53 = vmov 1326507024  }
   0x3   :  { %s12_s9 = sadd.s32 1013904242, %s11_s8  ;;  %s320_s0 = smov [#allocation3]  }
   0x4   :  { %s13_s10 = sshrl.u32 %s12_s9, 16  ;;  %v28_v3 = vmul.u32 128, %v22_v1  ;;  %s253_s18 = sshll.u32 %s320_s0, 4  ;;  %s254_s18 = int_to_ptr.vmem [resolvable:$true] %s253_s18 }
   0x5   :  { %s14_s11 = sxor.u32 %s13_s10, %s12_s9  ;;  %s255_s21 = sshll.u32 %s402_s1, 4  ;;  %s256_s21 = int_to_ptr.hbm [resolvable:$true] %s255_s21 }
   0x6   :  { %s15_s12 = smul.u32 2146121005, %s14_s11  ;;  %v29_v4 = vadd.s32 %v28_v3, %v24_v2  ;;  %s321_s22 = smov 128  }
   0x7   :  { %s322_s23 = smov 8  }
   0x8   :  { %s16_s13 = sshrl.u32 %s15_s12, 15 }
   0x9   :  { %s17_s14 = sxor.u32 %s16_s13, %s15_s12 }
   0xa   :  { %s18_s15 = smul.u32 2221713035, %s17_s14 }
   0xc   :  { %s19_s16 = sshrl.u32 %s18_s15, 16 }
   0xd   :  { %s20_s17 = sxor.u32 %s19_s16, %s18_s15 }
   0xe   :  { %v30_v5 = vstv %s20_s17 }
   0xf   :  { %v31_v6 = vadd.s32 %v30_v5, %v29_v4 }
  0x11   :  { %v32_v7 = vshrl.u32 %v31_v6, 16 }
  0x13   :  { %v33_v8 = vxor.u32 %v32_v7, %v31_v6 }
  0x15   :  { %v34_v9 = vmul.u32 2146121005, %v33_v8 }
  0x17   :  { %v35_v10 = vshrl.u32 %v34_v9, 15 }
  0x19   :  { %v36_v11 = vxor.u32 %v35_v10, %v34_v9 }
  0x1b   :  { %v37_v12 = vmul.u32 2221713035, %v36_v11 }
  0x1d   :  { %v38_v13 = vshrl.u32 %v37_v12, 16 }
  0x1f   :  { %v336_v14 = vxor.u32 %v38_v13, %v37_v12 }
  0x21   :  { %v40_v15 = vxor.u32 2654435769, %v336_v14 }
  0x23   :  { %v41_v16 = vshrl.u32 %v40_v15, 16 }
  0x25   :  { %v42_v17 = vxor.u32 %v41_v16, %v40_v15 }
  0x27   :  { %v43_v18 = vmul.u32 2146121005, %v42_v17 }
  0x29   :  { %v44_v19 = vshrl.u32 %v43_v18, 15 }
  0x2b   :  { %v45_v20 = vxor.u32 %v44_v19, %v43_v18 }
  0x2d   :  { %v46_v21 = vmul.u32 2221713035, %v45_v20 }
  0x2f   :  { %v47_v22 = vshrl.u32 %v46_v21, 16 }
  0x31   :  { %v48_v23 = vxor.u32 %v47_v22, %v46_v21 }
  0x33   :  { %v53_v24 = vshrl.u32 %v48_v23, 9 }
  0x35   :  { %v54_v25 = vor.u32 1065353216, %v53_v24 }
  0x37   :  { %v339_v26 = vadd.f32 -1.0, %v54_v25  ;;  %v49_v25 = vshrl.u32 %v336_v14, 9 }
  0x39   :  { %v342_v27 = vmul.f32 6.2831855, %v339_v26 }
  0x3b   :  { %v76_v28 = vand.u32 2139095040, %v342_v27  ;;  %v73_v30 = vand.u32 2147483647, %v342_v27  ;;  %vm75_vm12 = vcmp.lt.s32.totalorder %v342_v27, 0 }
  0x3d   :  { %v77_v29 = vshrl.u32 %v76_v28, 23  ;;  %v80_v33 = vand.u32 8388607, %v73_v30  ;;  %vm387_vm13 = vcmp.le.f32.partialorder %v73_v30, 0.7853982 }
  0x3f   :  { %v268_v31 = vadd.s32 4294967169, %v77_v29  ;;  %v81_v36 = vor.u32 8388608, %v80_v33 }
  0x41   :  { %v83_v32 = vadd.s32 1, %v268_v31  ;;  %v351_v55 = vshll.u32 %v81_v36, 8 }
  0x43   :  { %vm84_vm0 = vcmp.gt.s32.totalorder %v83_v32, 0  ;;  %v122_v3 = vand.u32 65535, %v351_v55  ;;  %v123_v4 = vshrl.u32 %v351_v55, 16 }
  0x44   :  { %v85_v34 = vsel %vm84_vm0, %v83_v32, 0  ;;  %v319_v32 = vmov 0  }
  0x45   :  { %v87_v35 = vand.u32 31, %v85_v34  ;;  %v348_v37 = vshrl.u32 %v85_v34, 5 }
  0x47   :  { %v88_v38 = vsub.s32 32, %v87_v35  ;;  %v90_v40 = vshll.u32 %v313_v39, %v87_v35  ;;  %v93_v42 = vshll.u32 %v314_v41, %v87_v35  ;;  %v96_v44 = vshll.u32 %v315_v43, %v87_v35 }
  0x48   :  { %v99_v46 = vshll.u32 %v316_v45, %v87_v35  ;;  %v102_v48 = vshll.u32 %v317_v47, %v87_v35  ;;  %vm105_vm1 = vcmp.lt.s32.totalorder %v348_v37, 1  ;;  %vm108_vm2 = vcmp.lt.s32.totalorder %v348_v37, 4 }
  0x49   :  { %v91_v49 = vshrl.u32 %v314_v41, %v88_v38  ;;  %v94_v50 = vshrl.u32 %v315_v43, %v88_v38  ;;  %v97_v51 = vshrl.u32 %v316_v45, %v88_v38  ;;  %v100_v52 = vshrl.u32 %v317_v47, %v88_v38 }
  0x4a   :  { %v103_v54 = vshrl.u32 %v318_v53, %v88_v38  ;;  %vm107_vm3 = vcmp.lt.s32.totalorder %v348_v37, 3  ;;  %vm106_vm4 = vcmp.lt.s32.totalorder %v348_v37, 2  ;;  %v89_v11 = vshrl.u32 %v313_v39, %v88_v38 }
  0x4b   :  { %v92_v56 = vor.u32 %v91_v49, %v90_v40  ;;  %v95_v57 = vor.u32 %v94_v50, %v93_v42  ;;  %v98_v58 = vor.u32 %v97_v51, %v96_v44  ;;  %v101_v59 = vor.u32 %v100_v52, %v99_v46 }
  0x4c   :  { %v104_v60 = vor.u32 %v103_v54, %v102_v48  ;;  %v50_v47 = vor.u32 1065353216, %v49_v25 }
  0x4d   :  { %v113_v61 = vsel %vm105_vm1, %v92_v56, %v95_v57  ;;  %v117_v62 = vsel %vm105_vm1, %v95_v57, %v98_v58  ;;  %v114_v63 = vsel %vm108_vm2, %v101_v59, 920167782  ;;  %v109_v28 = vsel %vm105_vm1, %v89_v11, %v92_v56 }
  0x4e   :  { %v118_v0 = vsel %vm108_vm2, %v104_v60, 1326507024  ;;  %v115_v1 = vsel %vm107_vm3, %v98_v58, %v114_v63  ;;  %v110_v31 = vsel %vm108_vm2, %v98_v58, 2102212464  ;;  %v52_v54 = vsub.f32 2.0, %v50_v47 }
  0x4f   :  { %v119_v2 = vsel %vm107_vm3, %v101_v59, %v118_v0  ;;  %v116_v5 = vsel %vm106_vm4, %v113_v61, %v115_v1  ;;  %v111_v14 = vsel %vm107_vm3, %v95_v57, %v110_v31  ;;  %vm216_vm3 = vweird.f32 %v342_v27 }
  0x50   :  { %v120_v6 = vsel %vm106_vm4, %v117_v62, %v119_v2  ;;  %v146_v9 = vand.u32 65535, %v116_v5  ;;  %v147_v10 = vshrl.u32 %v116_v5, 16  ;;  %v112_v50 = vsel %vm106_vm4, %v109_v28, %v111_v14 }
  0x51   :  { %v124_v7 = vand.u32 65535, %v120_v6  ;;  %v125_v8 = vshrl.u32 %v120_v6, 16  ;;  %v166_v56 = vmul.u32 %v351_v55, %v112_v50  ;;  %281 = vlog2.f32 %v52_v54 }
  0x52   :  { %v148_v16 = vmul.u32 %v146_v9, %v122_v3  ;;  %v149_v17 = vmul.u32 %v147_v10, %v122_v3  ;;  %v150_v18 = vmul.u32 %v146_v9, %v123_v4  ;;  %v151_v22 = vmul.u32 %v147_v10, %v123_v4 }
  0x53   :  { %v126_v12 = vmul.u32 %v124_v7, %v122_v3  ;;  %v127_v13 = vmul.u32 %v125_v8, %v122_v3  ;;  %v128_v15 = vmul.u32 %v124_v7, %v123_v4  ;;  %v129_v19 = vmul.u32 %v125_v8, %v123_v4 }
  0x54   :  { %v152_v23 = vshll.u32 %v149_v17, 16  ;;  %v154_v24 = vshll.u32 %v150_v18, 16  ;;  %v153_v40 = vshrl.u32 %v149_v17, 16  ;;  %v155_v45 = vshrl.u32 %v150_v18, 16 }
  0x55   :  { %v130_v20 = vshll.u32 %v127_v13, 16  ;;  %v132_v21 = vshll.u32 %v128_v15, 16  ;;  %v131_v35 = vshrl.u32 %v127_v13, 16  ;;  %v133_v42 = vshrl.u32 %v128_v15, 16 }
  0x56   :  { %vm156_vm6 = vc.u32 %v148_v16, %v152_v23  ;;  %v158_v34 = vadd.s32 %v152_v23, %v148_v16 }
  0x57   :  { %vm134_vm5 = vc.u32 %v126_v12, %v130_v20  ;;  %v136_v29 = vadd.s32 %v130_v20, %v126_v12  ;;  %v157_v38 = vsel %vm156_vm6, 1, %v319_v32  ;;  %v282_v62 = vpop.eup %281  ;;  %vm242_vm6 = vcmp.lt.f32.partialorder %v339_v26, 0.5 }
  0x58   :  { %v135_v33 = vsel %vm134_vm5, 1, %v319_v32  ;;  %v159_v41 = vadd.s32 %v157_v38, %v151_v22  ;;  %vm160_vm8 = vc.u32 %v158_v34, %v154_v24  ;;  %v162_v49 = vadd.s32 %v158_v34, %v154_v24 }
  0x59   :  { %v137_v36 = vadd.s32 %v135_v33, %v129_v19  ;;  %vm138_vm7 = vc.u32 %v136_v29, %v132_v21  ;;  %v161_v44 = vsel %vm160_vm8, 1, %v319_v32  ;;  %v58_v1 = vmul.f32 0.6931472, %v282_v62 }
  0x5a   :  { %v139_v39 = vsel %vm138_vm7, 1, %v319_v32  ;;  %v163_v46 = vadd.s32 %v161_v44, %v159_v41 }
  0x5b   :  { %v141_v43 = vadd.s32 %v139_v39, %v137_v36  ;;  %v59_v3 = vmul.f32 -2.0, %v58_v1 }
  0x5c   :  { %v164_v51 = vadd.s32 %v163_v46, %v153_v40 }
  0x5d   :  { %v142_v48 = vadd.s32 %v141_v43, %v131_v35  ;;  %283 = vrsqrt.f32 %v59_v3  ;;  %vm67_vm14 = vcmp.eq.f32.partialorder %v59_v3, inf  ;;  %vm69_vm0 = vcmp.eq.f32.partialorder %v59_v3, 0.0 }
  0x5e   :  { %v165_v53 = vadd.s32 %v164_v51, %v155_v45 }
  0x5f   :  { %v143_v52 = vadd.s32 %v142_v48, %v133_v42 }
  0x60   :  { %v169_v58 = vadd.s32 1, %v165_v53 }
  0x61   :  { %vm168_vm9 = vc.u32 %v143_v52, %v162_v49  ;;  %v167_v6 = vadd.s32 %v162_v49, %v143_v52  ;;  %v70_v49 = vand.u32 2147483648, %v59_v3 }
  0x62   :  { %v170_v57 = vsel %vm168_vm9, %v169_v58, %v165_v53 }
  0x63   :  { %v171_v59 = vadd.s32 %v170_v57, %v166_v56  ;;  %v284_v12 = vpop.eup %283 }
  0x64   :  { %v61_v18 = vmul.f32 %v284_v12, %v59_v3 }
  0x65   :  { %v172_v60 = vadd.s32 536870912, %v171_v59 }
  0x66   :  { %v62_v21 = vmul.f32 %v284_v12, %v61_v18 }
  0x67   :  { %v173_v61 = vshrl.u32 %v172_v60, 30 }
  0x68   :  { %v63_v25 = vmul.f32 0.5, %v62_v21 }
  0x69   :  { %v174_v63 = vshll.u32 %v173_v61, 30  ;;  %v197_v28 = vsub.s32 4, %v173_v61 }
  0x6a   :  { %v64_v34 = vsub.f32 1.5, %v63_v25 }
  0x6b   :  { %v175_v0 = vsub.s32 %v171_v59, %v174_v63  ;;  %v198_v35 = vsel %vm75_vm12, %v197_v28, %v173_v61 }
  0x6c   :  { %v200_v30 = vsel %vm387_vm13, 0, %v198_v35  ;;  %v65_v41 = vmul.f32 %v284_v12, %v64_v34 }
  0x6d   :  { %vm176_vm10 = vcmp.lt.s32.totalorder %v175_v0, 0  ;;  %v177_v37 = vsub.s32 0, %v175_v0  ;;  %v217_v43 = vand.u32 3, %v200_v30 }
  0x6e   :  { %v66_v46 = vmul.f32 %v65_v41, %v59_v3 }
  0x6f   :  { %v178_v2 = vsel %vm176_vm10, %v177_v37, %v175_v0  ;;  %vm222_vm15 = vcmp.eq.s32.totalorder %v217_v43, 2  ;;  %vm219_vm1 = vcmp.eq.s32.totalorder %v217_v43, 0  ;;  %vm218_vm2 = vcmp.lt.s32.totalorder %v217_v43, 2 }
  0x70   :  { %v179_v4 = vclz %v178_v2  ;;  %v68_v52 = vsel %vm67_vm14, %v59_v3, %v66_v46 }
  0x71   :  { %v71_v56 = vsel %vm69_vm0, %v70_v49, %v68_v52 }
  0x72   :  { %v269_v5 = vadd.s32 4294967294, %v179_v4 }
  0x74   :  { %vm270_vm11 = vcmp.lt.s32.totalorder %v269_v5, 0 }
  0x75   :  { %v182_v55 = vsel %vm270_vm11, 0, %v269_v5 }
  0x76   :  { %v183_v7 = vsub.s32 32, %v182_v55  ;;  %v184_v8 = vshll.u32 %v175_v0, %v182_v55  ;;  %v187_v9 = vsub.s32 4294967266, %v182_v55 }
  0x78   :  { %v185_v10 = vshrl.u32 %v167_v6, %v183_v7  ;;  %v188_v11 = vadd.s32 127, %v187_v9 }
  0x7a   :  { %v186_v13 = vor.u32 %v185_v10, %v184_v8  ;;  %v189_v15 = vshll.u32 %v188_v11, 23 }
  0x7c   :  { %v190_v16 = vor.u32 4788187, %v189_v15  ;;  %v193_v17 = vcvt.s32.f32 %v186_v13 }
  0x7e   :  { %v191_v19 = vand.u32 2147483647, %v190_v16 }
  0x80   :  { %v194_v20 = vmul.f32 %v193_v17, %v191_v19 }
  0x82   :  { %v195_v23 = vxor.u32 2147483648, %v194_v20 }
  0x84   :  { %v196_v24 = vsel %vm75_vm12, %v195_v23, %v194_v20 }
  0x85   :  { %v199_v29 = vsel %vm387_vm13, %v342_v27, %v196_v24 }
  0x86   :  { %v201_v31 = vmul.f32 %v199_v29, %v199_v29 }
  0x88   :  { %v202_v32 = vmul.f32 -0.001358992, %v201_v31  ;;  %v209_v33 = vmul.f32 -0.00019511016, %v201_v31 }
  0x8a   :  { %v203_v36 = vadd.f32 0.041655596, %v202_v32  ;;  %v210_v38 = vadd.f32 0.008332121, %v209_v33 }
  0x8c   :  { %v204_v39 = vmul.f32 %v203_v36, %v201_v31  ;;  %v211_v40 = vmul.f32 %v210_v38, %v201_v31 }
  0x8e   :  { %v205_v14 = vadd.f32 -0.4999988, %v204_v39  ;;  %v212_v42 = vadd.f32 -0.16666654, %v211_v40 }
  0x90   :  { %v206_v44 = vmul.f32 %v205_v14, %v201_v31  ;;  %v213_v45 = vmul.f32 %v212_v42, %v201_v31 }
  0x92   :  { %v207_v47 = vadd.f32 1.0, %v206_v44  ;;  %v214_v48 = vadd.f32 1.0, %v213_v45 }
  0x94   :  { %v215_v50 = vmul.f32 %v214_v48, %v199_v29  ;;  %v223_v51 = vxor.u32 2147483648, %v207_v47 }
  0x96   :  { %v220_v53 = vxor.u32 2147483648, %v215_v50  ;;  %v224_v54 = vsel %vm222_vm15, %v223_v51, %v215_v50 }
  0x98   :  { %v221_v58 = vsel %vm219_vm1, %v207_v47, %v220_v53 }
  0x99   :  { %v225_v57 = vsel %vm218_vm2, %v221_v58, %v224_v54 }
  0x9a   :  { %v226_v59 = vsel %vm216_vm3, nan, %v225_v57 }
  0x9b   :  { %v227_v60 = vmul.f32 %v226_v59, %v226_v59  ;;  %v245_v61 = vmul.f32 %v226_v59, %v71_v56 }
  0x9d   :  { %v228_v62 = vsub.f32 1.0, %v227_v60  ;;  %246 = vst [vmem:[#allocation3] sm:$0xff] %v245_v61 }
  0x9f   :  { %v229_v63 = vmax.f32 %v228_v62, 0.0 }
  0xa1   :  { %285 = vrsqrt.f32 %v229_v63  ;;  %vm237_vm4 = vcmp.eq.f32.partialorder %v229_v63, inf  ;;  %v240_v5 = vand.u32 2147483648, %v229_v63  ;;  %vm239_vm5 = vcmp.eq.f32.partialorder %v229_v63, 0.0 }
  0xa7   :  { %v286_v0 = vpop.eup %285 }
  0xa8   :  { %v231_v1 = vmul.f32 %v286_v0, %v229_v63 }
  0xaa   :  { %v232_v37 = vmul.f32 %v286_v0, %v231_v1 }
  0xac   :  { %v233_v2 = vmul.f32 0.5, %v232_v37 }
  0xae   :  { %v234_v3 = vsub.f32 1.5, %v233_v2 }
  0xb0   :  { %v235_v4 = vmul.f32 %v286_v0, %v234_v3 }
  0xb2   :  { %v236_v6 = vmul.f32 %v235_v4, %v229_v63 }
  0xb4   :  { %v238_v27 = vsel %vm237_vm4, %v229_v63, %v236_v6 }
  0xb5   :  { %v241_v55 = vsel %vm239_vm5, %v240_v5, %v238_v27 }
  0xb6   :  { %v243_v7 = vsub.f32 0.0, %v241_v55 }
  0xb8   :  { %v244_v8 = vsel %vm242_vm6, %v241_v55, %v243_v7 }
  0xb9   :  { %v247_v9 = vmul.f32 %v244_v8, %v71_v56 }
  0xbb   :  { %248 = vst [vmem:[#allocation3 + $0x8] sm:$0xff] %v247_v9 }
  0xbc   :  { %261 = dma.vmem_to_hbm [thread:$0]  %s254_s18, 256, %s256_s21, [#allocation4], %s321_s22, %s321_s22, %s322_s23  }
  0xbd   :  { %311 = dma.done.wait [#allocation4], 256  }
  0xbe   :  { %312 = vsyncadd [#allocation4], 4294967040 }
  0xbf   :  { %266 = vsyncpa [#allocation4], 1 }

</bundles_post_ra>
